<compile_context>
chip_gen: v6e
topology: v6e:2x2x1
jax: 0.10.0
libtpu: 0.0.40
codegen_flags: <defaults>
</compile_context>

<pallas_src>
import functools

import jax
import jax.numpy as jnp
from jax.experimental import pallas as pl
from jax.experimental.pallas import tpu as pltpu

# SDOF PINN instance sizes: scalar time input -> scalar displacement.
N_INPUT, N_OUTPUT, N_HIDDEN, N_LAYERS = 1, 1, 32, 3
assert N_INPUT == 1 and N_OUTPUT == 1, "VPU first/last-layer paths assume scalar in/out"

LANE = 128          # vreg lane width; batch-tile width must be a multiple of this
MAX_B_TILE = 4096   # cap per-tile lane extent (VMEM is nowhere near a limit at this size)


def _choose_tiling(batch):
    """Pad batch and split it into >=2 equal lane-multiple tiles (<= MAX_B_TILE each)."""
    bp = ((batch + 2 * LANE - 1) // (2 * LANE)) * (2 * LANE)      # multiple of 256
    n_tiles = max(2, -(-bp // MAX_B_TILE))                        # >=2 for v7x dual-TC
    b_tile = (-(-bp // n_tiles) + LANE - 1) // LANE * LANE        # multiple of 128
    bp = n_tiles * b_tile
    return bp, n_tiles, b_tile


def _mlp_kernel(x_ref, cols_ref, wh_ref, o_ref, *, n_hidden_layers):
    """Full MLP forward for one batch tile, entirely in VMEM (transposed layout).

    x_ref   : (1, 1, B_TILE)           batch tile as a dense lane row
    cols_ref: (N_HIDDEN, n_h + 4)      [:,0]=w0 col, [:,1]=b0, [:,2+i]=hidden bias i,
                                       [:,2+n_h]=wo col, [0,3+n_h]=output bias
    wh_ref  : (n_h, 32, 32)            hidden Linear weights, torch [out, in] layout
    o_ref   : (1, 1, B_TILE)           dense output row
    """
    x = x_ref[0]                                                  # (1, B_TILE)

    # Layer 0: N_INPUT == 1, so  (x @ W0.T).T == w0_col * x_row  (pure VPU broadcast).
    w0 = cols_ref[:, 0:1]                                         # (32, 1)
    b0 = cols_ref[:, 1:2]                                         # (32, 1)
    h = jnp.tanh(w0 * x + b0)                                     # (32, B_TILE)

    # Hidden Linear+Tanh blocks on the MXU: h <- tanh(W_i @ h + b_i).
    for i in range(n_hidden_layers):
        bi = cols_ref[:, 2 + i:3 + i]                             # (32, 1)
        h = jnp.tanh(
            jnp.dot(wh_ref[i], h, preferred_element_type=jnp.float32) + bi
        )

    # Output layer: N_OUTPUT == 1, so  y = sublane-reduce(h * wo_col) + bo  (VPU + XLU).
    wo = cols_ref[:, 2 + n_hidden_layers:3 + n_hidden_layers]     # (32, 1)
    bo = cols_ref[0:1, 3 + n_hidden_layers:4 + n_hidden_layers]   # (1, 1)
    y = jnp.sum(h * wo, axis=0, keepdims=True) + bo               # (1, B_TILE)
    o_ref[0] = y.astype(o_ref.dtype)


def init_params(key):
    """PyTorch-style Linear init (U(-1/sqrt(fan_in), 1/sqrt(fan_in))), deterministic."""
    dims = [N_INPUT] + [N_HIDDEN] * N_LAYERS + [N_OUTPUT]
    params = []
    for li in range(len(dims) - 1):
        fan_in, fan_out = dims[li], dims[li + 1]
        key, kw, kb = jax.random.split(key, 3)
        bound = 1.0 / jnp.sqrt(fan_in)
        W = jax.random.uniform(kw, (fan_out, fan_in), jnp.float32, -bound, bound)  # torch layout
        b = jax.random.uniform(kb, (fan_out,), jnp.float32, -bound, bound)
        params.append((W, b))
    return params


def pad_params(params):
    """Pack params into the kernel layout: column-vector stack + stacked hidden weights."""
    (W0, b0), hidden, (Wo, bo) = params[0], params[1:-1], params[-1]
    n_h = len(hidden)

    # Column-vector stack: w0 col, b0, hidden biases, wo col, output bias scalar.
    cols = jnp.zeros((N_HIDDEN, n_h + 4), jnp.float32)
    cols = cols.at[:, 0].set(W0[:, 0])          # W0 is (N_HIDDEN, 1)
    cols = cols.at[:, 1].set(b0)
    for i, (_, b) in enumerate(hidden):
        cols = cols.at[:, 2 + i].set(b)
    cols = cols.at[:, 2 + n_h].set(Wo[0, :])    # Wo is (1, N_HIDDEN)
    cols = cols.at[0, 3 + n_h].set(bo[0])       # scalar output bias

    # Hidden weights stay in torch [out, in] layout (W @ h in the transposed scheme).
    wh = jnp.stack([W for (W, _) in hidden], axis=0)              # (n_h, 32, 32)
    return cols, wh.astype(jnp.float32)


def bbnn_forward(x, packed_params):
    """Pallas forward: x [B, N_INPUT] -> y [B, N_OUTPUT]."""
    cols, wh = packed_params
    n_h = wh.shape[0]
    B = x.shape[0]
    Bp, n_tiles, b_tile = _choose_tiling(B)

    # Lane-dense input slab: (n_tiles, 1, B_TILE), zero-padded tail rows.
    xp = jnp.zeros((Bp,), jnp.float32).at[:B].set(x[:, 0].astype(jnp.float32))
    xp = xp.reshape(n_tiles, 1, b_tile)

    kernel = functools.partial(_mlp_kernel, n_hidden_layers=n_h)
    out = pl.pallas_call(
        kernel,
        out_shape=jax.ShapeDtypeStruct((n_tiles, 1, b_tile), jnp.float32),
        grid_spec=pltpu.PrefetchScalarGridSpec(
            num_scalar_prefetch=0,
            grid=(n_tiles,),
            in_specs=[
                pl.BlockSpec((1, 1, b_tile), lambda i: (i, 0, 0)),            # x tile (lane-dense)
                pl.BlockSpec((N_HIDDEN, n_h + 4), lambda i: (0, 0)),          # column-vector stack
                pl.BlockSpec((n_h, N_HIDDEN, N_HIDDEN), lambda i: (0, 0, 0)), # hidden weights
            ],
            out_specs=pl.BlockSpec((1, 1, b_tile), lambda i: (i, 0, 0)),      # lane-dense output
        ),
        compiler_params=pltpu.CompilerParams(
            dimension_semantics=("parallel",),   # batch tiles split across v7x TensorCores
        ),
    )(xp, cols, wh)

    # Slice padded batch rows off before handing back to the caller.
    return out.reshape(Bp)[:B].reshape(B, N_OUTPUT)


def bbnn_reference(x, params):
    """Pure-JAX reference identical to the PyTorch forward."""
    (W0, b0), hidden, (Wo, bo) = params[0], params[1:-1], params[-1]
    h = jnp.tanh(x @ W0.T + b0)
    for W, b in hidden:
        h = jnp.tanh(h @ W.T + b)
    return h @ Wo.T + bo


if __name__ == "__main__":
    key = jax.random.PRNGKey(0)
    key, kx = jax.random.split(key)

    params = init_params(key)
    packed = pad_params(params)

    # Not a multiple of the tile size (exercises batch padding); splits into 2 tiles of 512.
    batch = 1000
    x = jax.random.uniform(kx, (batch, N_INPUT), jnp.float32, 0.0, 1.0)

    y = jax.block_until_ready(bbnn_forward(x, packed))
    y_ref = bbnn_reference(x, params)

    assert y.shape == (batch, N_OUTPUT)
    assert jnp.allclose(y, y_ref, atol=1e-5, rtol=1e-5), "Pallas output mismatch vs reference"

    print("KERNEL_OK")
</pallas_src>

<mosaic_0001>
module attributes {stable_mosaic.version = 11 : i64} {
  func.func @_mlp_kernel(%arg0: i32, %arg1: memref<1x1x512xf32, #tpu.memory_space<vmem>>, %arg2: memref<32x6xf32, #tpu.memory_space<vmem>>, %arg3: memref<2x32x32xf32, #tpu.memory_space<vmem>>, %arg4: memref<1x1x512xf32, #tpu.memory_space<vmem>>) attributes {dimension_semantics = [#tpu.dimension_semantics<parallel>], iteration_bounds = array<i64: 2>, scalar_prefetch = 0 : i64, scratch_operands = 0 : i64, tpu.core_type = #tpu.core_type<tc>, window_params = [{transform_indices = @transform_0, window_bounds = array<i64: 1, 1, 512>}, {pipeline_mode = #tpu.pipeline_mode<synchronous>, transform_indices = @transform_1, window_bounds = array<i64: 32, 6>}, {pipeline_mode = #tpu.pipeline_mode<synchronous>, transform_indices = @transform_2, window_bounds = array<i64: 2, 32, 32>}, {transform_indices = @transform_3, window_bounds = array<i64: 1, 1, 512>}]} {
    %c0 = arith.constant 0 : index
    %c0_0 = arith.constant 0 : index
    %c0_1 = arith.constant 0 : index
    %0 = vector.load %arg1[%c0, %c0_0, %c0_1] : memref<1x1x512xf32, #tpu.memory_space<vmem>>, vector<1x1x512xf32>
    %1 = vector.shape_cast %0 : vector<1x1x512xf32> to vector<1x512xf32>
    %c0_2 = arith.constant 0 : index
    %c0_3 = arith.constant 0 : index
    %2 = vector.load %arg2[%c0_2, %c0_3] : memref<32x6xf32, #tpu.memory_space<vmem>>, vector<32x1xf32>
    %c0_4 = arith.constant 0 : index
    %c1 = arith.constant 1 : index
    %3 = vector.load %arg2[%c0_4, %c1] : memref<32x6xf32, #tpu.memory_space<vmem>>, vector<32x1xf32>
    %4 = vector.broadcast %2 : vector<32x1xf32> to vector<32x512xf32>
    %5 = vector.broadcast %1 : vector<1x512xf32> to vector<32x512xf32>
    %6 = arith.mulf %4, %5 : vector<32x512xf32>
    %7 = vector.broadcast %3 : vector<32x1xf32> to vector<32x512xf32>
    %8 = arith.addf %6, %7 : vector<32x512xf32>
    %9 = math.tanh %8 : vector<32x512xf32>
    %c0_5 = arith.constant 0 : index
    %c2 = arith.constant 2 : index
    %10 = vector.load %arg2[%c0_5, %c2] : memref<32x6xf32, #tpu.memory_space<vmem>>, vector<32x1xf32>
    %c0_6 = arith.constant 0 : index
    %c0_7 = arith.constant 0 : index
    %c0_8 = arith.constant 0 : index
    %11 = vector.load %arg3[%c0_6, %c0_7, %c0_8] : memref<2x32x32xf32, #tpu.memory_space<vmem>>, vector<1x32x32xf32>
    %12 = vector.shape_cast %11 : vector<1x32x32xf32> to vector<32x32xf32>
    %cst = arith.constant dense<0.000000e+00> : vector<32x512xf32>
    %13 = tpu.matmul %12, %9, %cst {dimension_numbers = #tpu.dot_dimension_numbers<[1], [0], [0], [1], [0, 0, 1, 1], [], []>} : vector<32x32xf32>, vector<32x512xf32>, vector<32x512xf32> -> vector<32x512xf32>
    %14 = vector.broadcast %10 : vector<32x1xf32> to vector<32x512xf32>
    %15 = arith.addf %13, %14 : vector<32x512xf32>
    %16 = math.tanh %15 : vector<32x512xf32>
    %c0_9 = arith.constant 0 : index
    %c3 = arith.constant 3 : index
    %17 = vector.load %arg2[%c0_9, %c3] : memref<32x6xf32, #tpu.memory_space<vmem>>, vector<32x1xf32>
    %c1_10 = arith.constant 1 : index
    %c0_11 = arith.constant 0 : index
    %c0_12 = arith.constant 0 : index
    %18 = vector.load %arg3[%c1_10, %c0_11, %c0_12] : memref<2x32x32xf32, #tpu.memory_space<vmem>>, vector<1x32x32xf32>
    %19 = vector.shape_cast %18 : vector<1x32x32xf32> to vector<32x32xf32>
    %cst_13 = arith.constant dense<0.000000e+00> : vector<32x512xf32>
    %20 = tpu.matmul %19, %16, %cst_13 {dimension_numbers = #tpu.dot_dimension_numbers<[1], [0], [0], [1], [0, 0, 1, 1], [], []>} : vector<32x32xf32>, vector<32x512xf32>, vector<32x512xf32> -> vector<32x512xf32>
    %21 = vector.broadcast %17 : vector<32x1xf32> to vector<32x512xf32>
    %22 = arith.addf %20, %21 : vector<32x512xf32>
    %23 = math.tanh %22 : vector<32x512xf32>
    %c0_14 = arith.constant 0 : index
    %c4 = arith.constant 4 : index
    %24 = vector.load %arg2[%c0_14, %c4] : memref<32x6xf32, #tpu.memory_space<vmem>>, vector<32x1xf32>
    %c0_15 = arith.constant 0 : index
    %c5 = arith.constant 5 : index
    %25 = vector.load %arg2[%c0_15, %c5] : memref<32x6xf32, #tpu.memory_space<vmem>>, vector<1x1xf32>
    %26 = vector.broadcast %24 : vector<32x1xf32> to vector<32x512xf32>
    %27 = arith.mulf %23, %26 : vector<32x512xf32>
    %cst_16 = arith.constant dense<0.000000e+00> : vector<512xf32>
    %28 = vector.multi_reduction <add>, %27, %cst_16 [0] : vector<32x512xf32> to vector<512xf32>
    %29 = vector.shape_cast %28 : vector<512xf32> to vector<1x512xf32>
    %30 = vector.broadcast %25 : vector<1x1xf32> to vector<1x512xf32>
    %31 = arith.addf %29, %30 : vector<1x512xf32>
    %c0_17 = arith.constant 0 : index
    %c0_18 = arith.constant 0 : index
    %c0_19 = arith.constant 0 : index
    %32 = vector.load %arg4[%c0_17, %c0_18, %c0_19] : memref<1x1x512xf32, #tpu.memory_space<vmem>>, vector<1x1x512xf32>
    %33 = vector.shape_cast %32 : vector<1x1x512xf32> to vector<1x512xf32>
    %34 = vector.shape_cast %31 : vector<1x512xf32> to vector<1x1x512xf32>
    tpu.vector_store %arg4[%c0_17, %c0_18, %c0_19], %34 {strides = array<i32>} : memref<1x1x512xf32, #tpu.memory_space<vmem>>, vector<1x1x512xf32>,
    return
  }
  func.func @transform_0(%arg0: i32) -> (i32, i32, i32) {
    %c0_i32 = arith.constant 0 : i32
    %c0_i32_0 = arith.constant 0 : i32
    %c0_i32_1 = arith.constant 0 : i32
    return %arg0, %c0_i32, %c0_i32_0 : i32, i32, i32
  }
  func.func @transform_1(%arg0: i32) -> (i32, i32) {
    %c0_i32 = arith.constant 0 : i32
    %c0_i32_0 = arith.constant 0 : i32
    %c0_i32_1 = arith.constant 0 : i32
    return %c0_i32, %c0_i32_0 : i32, i32
  }
  func.func @transform_2(%arg0: i32) -> (i32, i32, i32) {
    %c0_i32 = arith.constant 0 : i32
    %c0_i32_0 = arith.constant 0 : i32
    %c0_i32_1 = arith.constant 0 : i32
    %c0_i32_2 = arith.constant 0 : i32
    return %c0_i32, %c0_i32_0, %c0_i32_1 : i32, i32, i32
  }
  func.func @transform_3(%arg0: i32) -> (i32, i32, i32) {
    %c0_i32 = arith.constant 0 : i32
    %c0_i32_0 = arith.constant 0 : i32
    %c0_i32_1 = arith.constant 0 : i32
    return %arg0, %c0_i32, %c0_i32_0 : i32, i32, i32
  }
}

</mosaic_0001>

<bundles_post_ra>
// kernel: tpu_custom_call.1
= control target key start
LH: loop header
LB: loop body
LE: loop exit
PB: predicated region body
PF: predicated region fallthrough
CT: control target
= control target key end

     0   :  { %8 = vsyncpa [#allocation3], 0  ;;  %s1454_s0 = inlined_call_operand.vmem [shape: f32[2,1,512], index: 0, kind: input, shape index: {}]   ;;  %s1455_s1 = inlined_call_operand.vmem [shape: f32[32,6], index: 1, kind: input, shape index: {}]   ;;  %s1456_s2 = inlined_call_operand.hbm [shape: f32[2,32,32], index: 2, kind: input, shape index: {}]   ;;  %s1457_s3 = inlined_call_operand.hbm [shape: f32[2,1,512], index: 3, kind: output, shape index: {}]  }
   0x1   :  { %9 = vsyncpa [#allocation4], 0 }
   0x2   :  { %11 = vsyncpa [#allocation4 + $0x1], 0  ;;  %s1265_s12 = smov 0   ;;  %s1267_s13 = smov 0  }
   0x3   :  { %s1269_s14 = smov 0   ;;  %s1271_s15 = smov 0  }
   0x4 LB: > { %s1286_s16 = sadd.s32 4294967295, %s1231_s15   ;;  %s943_s17 = sadd.s32 4294967294, %s1231_s15   ;;  %s1231_s15 = sphi %s1271_s15, %s1465_s15   ;;  %s1227_s14 = sphi %s1269_s14, %s1464_s14   ;;  %s1223_s13 = sphi %s1267_s13, %s1463_s13   ;;  %s1219_s12 = sphi %s1265_s12, %s1462_s12  }
   0x5   : > { %s1290_s18 = sadd.s32 1, %s1231_s15   ;;  %s92_s19 = sadd.s32 1, %s1227_s14 }
   0x6   : > { %s89_s20 = ssub.s32 %s1231_s15, %s1290_s18  ;;  %p102_p0 = scmp.ne.s32.totalorder %s1227_s14, %s1223_s13 }
   0x7   : > { %p90_p1 = scmp.eq.s32.totalorder %s89_s20, 0  ;;  %p103_p2 = scmp.eq.s32.totalorder %s1286_s16, 1 }
   0x8   : > { %p108_p3 = scmp.ne.s32.totalorder %s1223_s13, %s1219_s12  ;;  %p109_p4 = scmp.eq.s32.totalorder %s943_s17, 1 }
   0x9   : > { %s1301_s21 = scalar_select %p90_p1, %s1227_s14, %s92_s19  }
   0xa   : > { %p1303_p5 = por %p103_p2, %p102_p0  ;;  %p1307_p6 = por %p109_p4, %p108_p3 }
   0xb   : > { %p944_p7 = scmp.ge.s32.totalorder %s1231_s15, 1  ;;  %p116_p8 = scmp.lt.s32.totalorder %s1231_s15, 3 }
   0xc   : > { %s1459_s23 = scalar_select %p1307_p6, 1, 0 }
   0xd   : > { %p987_p9 = scmp.eq.s32.totalorder %s1286_s16, 0  ;;  %p1314_p10 = pnand %p944_p7, %p116_p8 }
   0xe   : > { %s1233_s25 = smov [#allocation2]  }
   0xf   : > { %s131_s26 = sshll.u32 %s1233_s25, 4  ;;  %p979_p11 = pneg %p1314_p10  ;;  %s132_s26 = int_to_ptr.vmem [resolvable:$true] %s131_s26 }
  0x10   : > { %s1152_s27 = scalar_lea.vmem %s132_s26, 1024  ;;  %p1160_p3 = scmp.lt.s32.totalorder %s132_s26, %s132_s26 }
  0x11   : > { %p980_p12 = pnand %p987_p9, %p979_p11  ;;  %p1153_p0 = scmp.ne.s32.totalorder %s132_s26, %s1152_s27 }
  0x12   : > { %p1161_p4 = scmp.lt.s32.totalorder %s1152_s27, %s1152_s27 }
  0x13   : > { %p1143_p13 = pneg %p980_p12 }
  0x14   : > { %p1162_p6 = por %p1161_p4, %p1160_p3 }
  0x15   : > { %p1155_p1 = pnand %p1153_p0, %p1143_p13 }
  0x17   : > { %p1156_p2 = pneg %p1155_p1 }
  0x19   : > { %p1163_p7 = pnand %p1162_p6, %p1156_p2 }
  0x1b   : > { %1166 = shalt.err (!%p1163_p7)
}
  0x1c   : > { %s1234_s28 = smov 128   ;;  %s1235_s29 = smov 8  }
  0x1d   : > { %982 = dma.hbm_to_vmem [thread:$0]  (!%p980_p12), %s1456_s2, 1024, %s132_s26, [#allocation3], %s1234_s28, %s1234_s28, %s1235_s29  }
  0x1e   : > { %154 = sbr.rel (%p1314_p10) target bundleno = 692 (0x2b4), region = 32 }
  0x23   : > { %1210 = dma.done.wait (%p987_p9), [#allocation3], 1024  }
  0x24   : > { %1212 = vsyncadd (%p987_p9), [#allocation3], 4294966272  ;;  %v1236_v0 = vmov 1   ;;  %v1237_v1 = vmov 0   ;;  %v1334_v2 = vld [vmem:[%s1455_s1 + $0x18] sm:$0xff]  ;;  %v1341_v3 = vld [vmem:[%s1455_s1 + $0x10] sm:$0xff]  ;;  %v207_v8 = vlaneseq }
  0x25   : > { %1034 = vset.pattern.permute.xlu1 %v1236_v0  ;;  %1033 = vset.pattern.permute.xlu0 %v1237_v1  ;;  %v1346_v4 = vld [vmem:[%s1455_s1 + $0x8] sm:$0xff]  ;;  %v1353_v5 = vld [vmem:[%s1455_s1] sm:$0xff]  ;;  %v1238_v6 = vmov 0.0   ;;  %v1239_v7 = vmov 2   ;;  %p177_p6 = scmp.lt.s32.totalorder %s1286_s16, 1  ;;  %vm311_vm0 = vcmask 261120  }
  0x26   : > { %256 = vperm.xlu1 %1034, %v1334_v2   ;;  %203 = vperm.xlu0 %1033, %v1334_v2   ;;  %v1368_v9 = vshrl.u32 %v207_v8, 7  ;;  %s174_s29 = sand.u32 1, %s1223_s13   ;;  %s972_s4 = sshll.u32 %s1286_s16, 6  ;;  %vm854_vm1 = vcmp.lt.s32.totalorder %v207_v8, 512 }
  0x27   : > { %388 = vmatprep.mubr.f32.mxu0 %v1238_v6  ;;  %477 = vmatprep.mubr.f32.mxu1 %v1238_v6  ;;  %s178_s19 = scalar_select %p177_p6, %s1286_s16, 1 }
  0x28   : > { %v209_v10 = vsub.s32 0, %v1368_v9  ;;  %v217_v11 = vsub.s32 2, %v1368_v9  ;;  %v213_v12 = vsub.s32 1, %v1368_v9  ;;  %v221_v13 = vsub.s32 3, %v1368_v9  ;;  %s949_s30 = sshll.u32 %s174_s29, 2  ;;  %s870_s9 = scalar_lea.hbm %s1457_s3, %s972_s4 }
  0x29   : > { %s950_s20 = sshll.u32 %s178_s19, 2  ;;  %s176_s5 = scalar_lea.vmem [#allocation5], %s949_s30 }
  0x2a   : > { %1035 = vset.pattern.permute.xlu1 %v1237_v1  ;;  %198 = vperm.xlu0 %1033, %v1341_v3   ;;  %s180_s26 = scalar_lea.vmem %s1454_s0, %s950_s20  ;;  %s872_s6 = sshll.u32 %s176_s5, 4  ;;  %s873_s6 = int_to_ptr.vmem [resolvable:$true] %s872_s6 }
  0x2b   : > { %193 = vperm.xlu1 %1035, %v1346_v4   ;;  %v181_v14 = vld [vmem:[%s180_s26] sm:$0xf]  ;;  %s858_s10 = scalar_lea.sflag [#allocation4], %s174_s29  ;;  %s1167_s11 = scalar_lea.vmem %s873_s6, 64 }
  0x2c   : > { %v210_v15 = vrot.slane %v181_v14, %v209_v10  ;;  %v218_v16 = vrot.slane %v181_v14, %v217_v11  ;;  %v214_v17 = vrot.slane %v181_v14, %v213_v12  ;;  %v222_v18 = vrot.slane %v181_v14, %v221_v13  ;;  %p1168_p8 = scmp.ne.s32.totalorder %s873_s6, %s1167_s11  ;;  %s1244_s17 = smov [#allocation5]  }
  0x2d   : > { %s1171_s16 = sshll.u32 %s1244_s17, 4  ;;  %s1172_s16 = int_to_ptr.vmem [resolvable:$false] %s1171_s16 }
  0x2e   : > { %1036 = vset.pattern.permute.xlu0 %v1236_v0  ;;  %p1169_p9 = pnand %p1168_p8, %p1303_p5  ;;  %s1173_s19 = scalar_lea.vmem %s1172_s16, 128 }
  0x2f   : > { %252 = vperm.xlu0 %1036, %v1341_v3   ;;  %188 = vperm.xlu1 %1035, %v1353_v5   ;;  %p1174_p11 = scmp.lt.s32.totalorder %s873_s6, %s1172_s16  ;;  %p1175_p12 = scmp.lt.s32.totalorder %s1173_s19, %s1167_s11 }
  0x30   : > { %p1170_p10 = pneg %p1169_p9 }
  0x31   : > { %p1176_p13 = por %p1175_p12, %p1174_p11 }
  0x33   : > { %244 = vperm.xlu0 %1036, %v1353_v5   ;;  %1037 = vset.pattern.permute.xlu1 %v1236_v0  ;;  %p1177_p0 = pnand %p1176_p13, %p1170_p10 }
  0x34   : > { %248 = vperm.xlu1 %1037, %v1346_v4  }
  0x37   : > { %1039 = vset.pattern.permute.xlu0 %v1239_v7 }
  0x38   : > { %1038 = vset.pattern.permute.xlu1 %v1239_v7  ;;  %304 = vperm.xlu0 %1039, %v1341_v3  }
  0x39   : > { %308 = vperm.xlu1 %1038, %v1334_v2  }
  0x3d   : > { %300 = vperm.xlu1 %1038, %v1346_v4  }
  0x41   : > { %296 = vperm.xlu1 %1038, %v1353_v5  }
  0xa1   : > { %v257_v19 = vpop.permute.xlu1 %256  ;;  %v204_v20 = vpop.permute.xlu0 %203 }
  0xa2   : > { %v239_v21 = vmul.f32 %v210_v15, %v204_v20  ;;  %v241_v22 = vmul.f32 %v218_v16, %v204_v20  ;;  %v240_v23 = vmul.f32 %v214_v17, %v204_v20  ;;  %v242_v24 = vmul.f32 %v222_v18, %v204_v20  ;;  %v293_v20 = vld [vmem:[#allocation2 + $0x10] sm:$0xff] }
  0xa4   : > { %v271_v25 = vadd.f32 %v257_v19, %v239_v21  ;;  %v273_v26 = vadd.f32 %v257_v19, %v241_v22  ;;  %v272_v27 = vadd.f32 %v257_v19, %v240_v23  ;;  %v274_v29 = vadd.f32 %v257_v19, %v242_v24  ;;  %v292_v19 = vld [vmem:[#allocation2 + $0x8] sm:$0xff]  ;;  %v294_v21 = vld [vmem:[#allocation2 + $0x18] sm:$0xff]  ;;  %v745_v24 = vld [vmem:[%s1455_s1] sm:$0x1] }
  0xa5   : > { %v199_v28 = vpop.permute.xlu0 %198  ;;  %v1240_v22 = vmov 3   ;;  %v1241_v23 = vmov 4  }
  0xa6   : > { %1045 = vtanh.f32 %v271_v25  ;;  %v194_v30 = vpop.permute.xlu1 %193  ;;  %v235_v31 = vmul.f32 %v210_v15, %v199_v28  ;;  %v236_v32 = vmul.f32 %v214_v17, %v199_v28  ;;  %v237_v33 = vmul.f32 %v218_v16, %v199_v28  ;;  %1041 = vset.pattern.permute.xlu1 %v1240_v22  ;;  %1040 = vset.pattern.permute.xlu0 %v1240_v22 }
  0xa7   : > { %1047 = vtanh.f32 %v273_v26  ;;  %v238_v34 = vmul.f32 %v222_v18, %v199_v28  ;;  %v231_v43 = vmul.f32 %v210_v15, %v194_v30  ;;  %v232_v45 = vmul.f32 %v214_v17, %v194_v30  ;;  %528 = vperm.xlu1 %1041, %v1346_v4   ;;  %524 = vperm.xlu0 %1040, %v1353_v5  }
  0xa8   : > { %1049 = vtanh.f32 %v272_v27  ;;  %v233_v47 = vmul.f32 %v218_v16, %v194_v30  ;;  %v234_v49 = vmul.f32 %v222_v18, %v194_v30  ;;  %v1242_v25 = vmov 5  }
  0xa9   : > { %1051 = vtanh.f32 %v274_v29 }
  0xaa   : > { %v253_v35 = vpop.permute.xlu0 %252  ;;  %v189_v36 = vpop.permute.xlu1 %188 }
  0xab   : > { %v267_v37 = vadd.f32 %v253_v35, %v235_v31  ;;  %v268_v38 = vadd.f32 %v253_v35, %v236_v32  ;;  %v269_v39 = vadd.f32 %v253_v35, %v237_v33  ;;  %v270_v40 = vadd.f32 %v253_v35, %v238_v34  ;;  %532 = vperm.xlu1 %1041, %v1341_v3  }
  0xac   : > { %v228_v41 = vmul.f32 %v214_v17, %v189_v36  ;;  %v227_v52 = vmul.f32 %v210_v15, %v189_v36  ;;  %v230_v55 = vmul.f32 %v222_v18, %v189_v36  ;;  %v229_v58 = vmul.f32 %v218_v16, %v189_v36  ;;  %v291_v15 = vld [vmem:[#allocation2] sm:$0xff]  ;;  %536 = vperm.xlu0 %1040, %v1334_v2  }
  0xad   : > { %1053 = vtanh.f32 %v267_v37 }
  0xae   : > { %1055 = vtanh.f32 %v268_v38  ;;  %v245_v42 = vpop.permute.xlu0 %244 }
  0xaf   : > { %1057 = vtanh.f32 %v269_v39  ;;  %v249_v44 = vpop.permute.xlu1 %248  ;;  %v260_v46 = vadd.f32 %v245_v42, %v228_v41  ;;  %v259_v59 = vadd.f32 %v245_v42, %v227_v52  ;;  %v262_v61 = vadd.f32 %v245_v42, %v230_v55  ;;  %1042 = vset.pattern.permute.xlu1 %v1241_v23 }
  0xb0   : > { %1059 = vtanh.f32 %v270_v40  ;;  %v263_v48 = vadd.f32 %v249_v44, %v231_v43  ;;  %v264_v50 = vadd.f32 %v249_v44, %v232_v45  ;;  %v265_v53 = vadd.f32 %v249_v44, %v233_v47  ;;  %1043 = vset.pattern.permute.xlu0 %v1241_v23  ;;  %747 = vperm.xlu1 %1042, %v1353_v5  }
  0xb1   : > { %1061 = vtanh.f32 %v260_v46  ;;  %v266_v56 = vadd.f32 %v249_v44, %v234_v49  ;;  %v261_v62 = vadd.f32 %v245_v42, %v229_v58  ;;  %751 = vperm.xlu0 %1043, %v1346_v4  }
  0xb2   : > { %1063 = vtanh.f32 %v263_v48 }
  0xb3   : > { %v1046_v51 = vpop.eup %1045  ;;  %1065 = vtanh.f32 %v264_v50  ;;  %v305_v35 = vpop.permute.xlu0 %304 }
  0xb4   : > { %v1048_v54 = vpop.eup %1047  ;;  %1067 = vtanh.f32 %v265_v53  ;;  %755 = vperm.xlu1 %1042, %v1341_v3   ;;  %v309_v26 = vpop.permute.xlu1 %308 }
  0xb5   : > { %v1050_v57 = vpop.eup %1049  ;;  %1069 = vtanh.f32 %v266_v56  ;;  %1044 = vset.pattern.permute.xlu0 %v1242_v25 }
  0xb6   : > { %v1052_v60 = vpop.eup %1051  ;;  %348 = vmatprep.subr.mxu0 %v1050_v57  ;;  %1071 = vtanh.f32 %v259_v59  ;;  %816 = vperm.xlu0 %1044, %v745_v24  }
  0xb7   : > { %437 = vmatprep.subr.mxu1 %v1052_v60  ;;  %349 = vmatpush1.msra.mxu0 %v1046_v51  ;;  %1073 = vtanh.f32 %v262_v61 }
  0xb8   : > { %438 = vmatpush1.msra.mxu1 %v1048_v54  ;;  %1075 = vtanh.f32 %v261_v62  ;;  %759 = vperm.xlu1 %1042, %v1334_v2   ;;  %v301_v27 = vpop.permute.xlu1 %300 }
  0xba   : > { %v1054_v63 = vpop.eup %1053 }
  0xbb   : > { %v1056_v0 = vpop.eup %1055 }
  0xbc   : > { %v1058_v1 = vpop.eup %1057  ;;  %350 = vmatprep.subr.mxu0 %v1056_v0  ;;  %v297_v31 = vpop.permute.xlu1 %296 }
  0xbd   : > { %v1060_v7 = vpop.eup %1059  ;;  %351 = vmatpush1.msra.mxu0 %v1054_v63 }
  0xbe   : > { %439 = vmatprep.subr.mxu1 %v1060_v7  ;;  %v1062_v10 = vpop.eup %1061 }
  0xbf   : > { %440 = vmatpush1.msra.mxu1 %v1058_v1  ;;  %v1064_v11 = vpop.eup %1063 }
  0xc0   : > { %v1066_v12 = vpop.eup %1065 }
  0xc1   : > { %v1068_v13 = vpop.eup %1067  ;;  %352 = vmatprep.subr.mxu0 %v1066_v12 }
  0xc2   : > { %v1070_v14 = vpop.eup %1069  ;;  %353 = vmatpush1.msra.mxu0 %v1064_v11 }
  0xc3   : > { %v1072_v16 = vpop.eup %1071  ;;  %441 = vmatprep.subr.mxu1 %v1070_v14  ;;  %354 = vmatprep.subr.mxu0 %v1062_v10 }
  0xc4   : > { %v1074_v17 = vpop.eup %1073  ;;  %442 = vmatpush1.msra.mxu1 %v1068_v13  ;;  %355 = vmatpush1.msra.mxu0 %v1072_v16 }
  0xc5   : > { %v1076_v18 = vpop.eup %1075  ;;  %443 = vmatprep.subr.mxu1 %v1074_v17  ;;  %951 = vmatmul.mubr.msk.f32.vlgmr.msra.gmra.mxu0 %vm311_vm0, %v291_v15 }
  0xc6   : > { %444 = vmatpush1.msra.mxu1 %v1076_v18  ;;  %394 = vmatprep.mubr.f32.mxu0 %v1238_v6  ;;  %v520_v18 = vld [vmem:[#allocation2 + $0x28] sm:$0xff] }
  0xc7   : > { %955 = vmatmul.mubr.msk.f32.vlgmr.msra.gmra.mxu1 %vm311_vm0, %v291_v15  ;;  %v519_v15 = vld [vmem:[#allocation2 + $0x20] sm:$0xff] }
  0xc8   : > { %483 = vmatprep.mubr.f32.mxu1 %v1238_v6 }
  0xc9   : > { %952 = vmatmul.mubr.msk.f32.gmra.mxu0 %vm311_vm0, %v292_v19 }
  0xca   : > { %400 = vmatprep.mubr.f32.mxu0 %v1238_v6 }
  0xcb   : > { %956 = vmatmul.mubr.msk.f32.gmra.mxu1 %vm311_vm0, %v292_v19  ;;  %v521_v19 = vld [vmem:[#allocation2 + $0x30] sm:$0xff] }
  0xcc   : > { %489 = vmatprep.mubr.f32.mxu1 %v1238_v6 }
  0xcd   : > { %953 = vmatmul.mubr.msk.f32.gmra.mxu0 %vm311_vm0, %v293_v20 }
  0xce   : > { %406 = vmatprep.mubr.f32.mxu0 %v1238_v6 }
  0xcf   : > { %957 = vmatmul.mubr.msk.f32.gmra.mxu1 %vm311_vm0, %v293_v20  ;;  %v522_v20 = vld [vmem:[#allocation2 + $0x38] sm:$0xff] }
  0xd0   : > { %495 = vmatprep.mubr.f32.mxu1 %v1238_v6 }
  0xd1   : > { %954 = vmatmul.mubr.msk.f32.gmra.mxu0 %vm311_vm0, %v294_v21 }
  0xd2   : > { %615 = vmatprep.mubr.f32.mxu0 %v1238_v6 }
  0xd3   : > { %958 = vmatmul.mubr.msk.f32.gmra.mxu1 %vm311_vm0, %v294_v21 }
  0xd4   : > { %704 = vmatprep.mubr.f32.mxu1 %v1238_v6 }
 0x122   : > { %v525_v21 = vpop.permute.xlu0 %524  ;;  %v529_v23 = vpop.permute.xlu1 %528 }
 0x185   : > { %v390_v28 = vpop.f32.mrf.mxu0 }
 0x186   : > { %v391_v34 = vadd.f32 %v390_v28, %v297_v31 }
 0x187   : > { %v479_v29 = vpop.f32.mrf.mxu1  ;;  %v392_v30 = vpop.f32.mrf.mxu0 }
 0x188   : > { %v393_v36 = vadd.f32 %v392_v30, %v297_v31  ;;  %1077 = vtanh.f32 %v391_v34  ;;  %v480_v57 = vadd.f32 %v479_v29, %v297_v31 }
 0x189   : > { %v481_v5 = vpop.f32.mrf.mxu1  ;;  %v396_v32 = vpop.f32.mrf.mxu0 }
 0x18a   : > { %v397_v38 = vadd.f32 %v396_v32, %v301_v27  ;;  %1079 = vtanh.f32 %v393_v36  ;;  %v482_v56 = vadd.f32 %v481_v5, %v297_v31 }
 0x18b   : > { %v485_v4 = vpop.f32.mrf.mxu1  ;;  %v398_v33 = vpop.f32.mrf.mxu0 }
 0x18c   : > { %v399_v39 = vadd.f32 %v398_v33, %v301_v27  ;;  %1081 = vtanh.f32 %v397_v38  ;;  %v486_v55 = vadd.f32 %v485_v4, %v301_v27  ;;  %v533_v33 = vpop.permute.xlu1 %532 }
 0x18d   : > { %v487_v37 = vpop.f32.mrf.mxu1  ;;  %v402_v3 = vpop.f32.mrf.mxu0 }
 0x18e   : > { %v403_v2 = vadd.f32 %v402_v3, %v305_v35  ;;  %1083 = vtanh.f32 %v399_v39  ;;  %v488_v54 = vadd.f32 %v487_v37, %v301_v27 }
 0x18f   : > { %v491_v40 = vpop.f32.mrf.mxu1  ;;  %v404_v41 = vpop.f32.mrf.mxu0 }
 0x190   : > { %v405_v42 = vadd.f32 %v404_v41, %v305_v35  ;;  %1085 = vtanh.f32 %v403_v2  ;;  %v492_v53 = vadd.f32 %v491_v40, %v305_v35 }
 0x191   : > { %v493_v43 = vpop.f32.mrf.mxu1  ;;  %v408_v44 = vpop.f32.mrf.mxu0 }
 0x192   : > { %v409_v45 = vadd.f32 %v408_v44, %v309_v26  ;;  %1087 = vtanh.f32 %v405_v42  ;;  %v494_v51 = vadd.f32 %v493_v43, %v305_v35  ;;  %v537_v43 = vpop.permute.xlu0 %536 }
 0x193   : > { %v497_v46 = vpop.f32.mrf.mxu1  ;;  %v410_v47 = vpop.f32.mrf.mxu0 }
 0x194   : > { %v411_v48 = vadd.f32 %v410_v47, %v309_v26  ;;  %v498_v49 = vadd.f32 %v497_v46, %v309_v26  ;;  %1089 = vtanh.f32 %v409_v45 }
 0x195   : > { %v499_v50 = vpop.f32.mrf.mxu1  ;;  %v1078_v58 = vpop.eup %1077 }
 0x196   : > { %v500_v52 = vadd.f32 %v499_v50, %v309_v26  ;;  %1091 = vtanh.f32 %v411_v48 }
 0x197   : > { %v1080_v59 = vpop.eup %1079 }
 0x198   : > { %1093 = vtanh.f32 %v500_v52 }
 0x199   : > { %1095 = vtanh.f32 %v498_v49  ;;  %v1082_v60 = vpop.eup %1081 }
 0x19a   : > { %1097 = vtanh.f32 %v494_v51 }
 0x19b   : > { %1099 = vtanh.f32 %v492_v53  ;;  %v1084_v61 = vpop.eup %1083  ;;  %v748_v53 = vpop.permute.xlu1 %747 }
 0x19c   : > { %1101 = vtanh.f32 %v488_v54 }
 0x19d   : > { %1103 = vtanh.f32 %v486_v55  ;;  %v1086_v62 = vpop.eup %1085 }
 0x19e   : > { %1105 = vtanh.f32 %v482_v56 }
 0x19f   : > { %1107 = vtanh.f32 %v480_v57  ;;  %v1088_v63 = vpop.eup %1087 }
 0x1a1   : > { %v1090_v0 = vpop.eup %1089 }
 0x1a3   : > { %v1092_v1 = vpop.eup %1091 }
 0x1a4   : > { %575 = vmatprep.subr.mxu0 %v1092_v1 }
 0x1a5   : > { %v1094_v7 = vpop.eup %1093  ;;  %576 = vmatpush1.msra.mxu0 %v1090_v0 }
 0x1a6   : > { %v1096_v10 = vpop.eup %1095  ;;  %664 = vmatprep.subr.mxu1 %v1094_v7  ;;  %577 = vmatprep.subr.mxu0 %v1088_v63 }
 0x1a7   : > { %v1098_v11 = vpop.eup %1097  ;;  %665 = vmatpush1.msra.mxu1 %v1096_v10  ;;  %578 = vmatpush1.msra.mxu0 %v1086_v62 }
 0x1a8   : > { %v1100_v12 = vpop.eup %1099  ;;  %666 = vmatprep.subr.mxu1 %v1098_v11  ;;  %579 = vmatprep.subr.mxu0 %v1084_v61  ;;  %v756_v61 = vpop.permute.xlu1 %755 }
 0x1a9   : > { %v1102_v13 = vpop.eup %1101  ;;  %667 = vmatpush1.msra.mxu1 %v1100_v12  ;;  %580 = vmatpush1.msra.mxu0 %v1082_v60 }
 0x1aa   : > { %v1104_v14 = vpop.eup %1103  ;;  %668 = vmatprep.subr.mxu1 %v1102_v13  ;;  %581 = vmatprep.subr.mxu0 %v1080_v59 }
 0x1ab   : > { %v1106_v16 = vpop.eup %1105  ;;  %669 = vmatpush1.msra.mxu1 %v1104_v14  ;;  %582 = vmatpush1.msra.mxu0 %v1078_v58  ;;  %v752_v58 = vpop.permute.xlu0 %751 }
 0x1ac   : > { %v1108_v17 = vpop.eup %1107  ;;  %670 = vmatprep.subr.mxu1 %v1106_v16  ;;  %959 = vmatmul.mubr.msk.f32.vlgmr.msra.gmra.mxu0 %vm311_vm0, %v519_v15 }
 0x1ad   : > { %671 = vmatpush1.msra.mxu1 %v1108_v17  ;;  %621 = vmatprep.mubr.f32.mxu0 %v1238_v6 }
 0x1ae   : > { %963 = vmatmul.mubr.msk.f32.vlgmr.msra.gmra.mxu1 %vm311_vm0, %v519_v15 }
 0x1af   : > { %710 = vmatprep.mubr.f32.mxu1 %v1238_v6 }
 0x1b0   : > { %960 = vmatmul.mubr.msk.f32.gmra.mxu0 %vm311_vm0, %v520_v18 }
 0x1b1   : > { %627 = vmatprep.mubr.f32.mxu0 %v1238_v6 }
 0x1b2   : > { %964 = vmatmul.mubr.msk.f32.gmra.mxu1 %vm311_vm0, %v520_v18 }
 0x1b3   : > { %716 = vmatprep.mubr.f32.mxu1 %v1238_v6 }
 0x1b4   : > { %961 = vmatmul.mubr.msk.f32.gmra.mxu0 %vm311_vm0, %v521_v19 }
 0x1b5   : > { %633 = vmatprep.mubr.f32.mxu0 %v1238_v6 }
 0x1b6   : > { %965 = vmatmul.mubr.msk.f32.gmra.mxu1 %vm311_vm0, %v521_v19 }
 0x1b7   : > { %722 = vmatprep.mubr.f32.mxu1 %v1238_v6 }
 0x1b8   : > { %962 = vmatmul.mubr.msk.f32.gmra.mxu0 %vm311_vm0, %v522_v20 }
 0x1ba   : > { %966 = vmatmul.mubr.msk.f32.gmra.mxu1 %vm311_vm0, %v522_v20 }
 0x26c   : > { %v617_v22 = vpop.f32.mrf.mxu0 }
 0x26d   : > { %v618_v25 = vadd.f32 %v617_v22, %v525_v21 }
 0x26e   : > { %v706_v24 = vpop.f32.mrf.mxu1  ;;  %v619_v26 = vpop.f32.mrf.mxu0 }
 0x26f   : > { %v707_v27 = vadd.f32 %v706_v24, %v525_v21  ;;  %v620_v29 = vadd.f32 %v619_v26, %v525_v21  ;;  %1109 = vtanh.f32 %v618_v25  ;;  %v760_v25 = vpop.permute.xlu1 %759 }
 0x270   : > { %v708_v28 = vpop.f32.mrf.mxu1  ;;  %v623_v30 = vpop.f32.mrf.mxu0 }
 0x271   : > { %v709_v31 = vadd.f32 %v708_v28, %v525_v21  ;;  %1111 = vtanh.f32 %v707_v27  ;;  %v624_v32 = vadd.f32 %v623_v30, %v529_v23 }
 0x272   : > { %v712_v5 = vpop.f32.mrf.mxu1  ;;  %1113 = vtanh.f32 %v620_v29  ;;  %v625_v4 = vpop.f32.mrf.mxu0 }
 0x273   : > { %v713_v6 = vadd.f32 %v712_v5, %v529_v23  ;;  %1115 = vtanh.f32 %v709_v31  ;;  %v626_v34 = vadd.f32 %v625_v4, %v529_v23 }
 0x274   : > { %1117 = vtanh.f32 %v624_v32  ;;  %v714_v35 = vpop.f32.mrf.mxu1  ;;  %v629_v37 = vpop.f32.mrf.mxu0 }
 0x275   : > { %1119 = vtanh.f32 %v713_v6  ;;  %v715_v36 = vadd.f32 %v714_v35, %v529_v23  ;;  %v630_v38 = vadd.f32 %v629_v37, %v533_v33 }
 0x276   : > { %1121 = vtanh.f32 %v626_v34  ;;  %v718_v3 = vpop.f32.mrf.mxu1  ;;  %v631_v40 = vpop.f32.mrf.mxu0 }
 0x277   : > { %1123 = vtanh.f32 %v715_v36  ;;  %v719_v39 = vadd.f32 %v718_v3, %v533_v33  ;;  %v632_v41 = vadd.f32 %v631_v40, %v533_v33 }
 0x278   : > { %1125 = vtanh.f32 %v630_v38  ;;  %v720_v2 = vpop.f32.mrf.mxu1  ;;  %v635_v44 = vpop.f32.mrf.mxu0 }
 0x279   : > { %1127 = vtanh.f32 %v719_v39  ;;  %v721_v42 = vadd.f32 %v720_v2, %v533_v33  ;;  %v636_v45 = vadd.f32 %v635_v44, %v537_v43 }
 0x27a   : > { %1129 = vtanh.f32 %v632_v41  ;;  %v724_v46 = vpop.f32.mrf.mxu1  ;;  %v637_v48 = vpop.f32.mrf.mxu0 }
 0x27b   : > { %1131 = vtanh.f32 %v721_v42  ;;  %v725_v47 = vadd.f32 %v724_v46, %v537_v43  ;;  %v638_v49 = vadd.f32 %v637_v48, %v537_v43  ;;  %v1243_v48 = vmov 1966171168  }
 0x27c   : > { %1133 = vtanh.f32 %v636_v45  ;;  %v726_v50 = vpop.f32.mrf.mxu1  ;;  %v1110_v51 = vpop.eup %1109 }
 0x27d   : > { %1135 = vtanh.f32 %v725_v47  ;;  %v727_v52 = vadd.f32 %v726_v50, %v537_v43  ;;  %v762_v10 = vmul.f32 %v1110_v51, %v748_v53 }
 0x27e   : > { %v1112_v54 = vpop.eup %1111  ;;  %1137 = vtanh.f32 %v638_v49  ;;  %v830_v49 = vunpack.c.l.s4 %v1243_v48 }
 0x27f   : > { %v1114_v55 = vpop.eup %1113  ;;  %1139 = vtanh.f32 %v727_v52  ;;  %v764_v14 = vmul.f32 %v1112_v54, %v748_v53 }
 0x280   : > { %v1116_v56 = vpop.eup %1115  ;;  %v763_v18 = vmul.f32 %v1114_v55, %v748_v53 }
 0x281   : > { %v1118_v57 = vpop.eup %1117  ;;  %v765_v22 = vmul.f32 %v1116_v56, %v748_v53 }
 0x282   : > { %v1120_v59 = vpop.eup %1119  ;;  %v766_v63 = vmul.f32 %v1118_v57, %v752_v58 }
 0x283   : > { %v1122_v60 = vpop.eup %1121  ;;  %v768_v1 = vmul.f32 %v1120_v59, %v752_v58 }
 0x284   : > { %v1124_v62 = vpop.eup %1123  ;;  %v767_v11 = vmul.f32 %v1122_v60, %v752_v58  ;;  %v778_v19 = vadd.f32 %v766_v63, %v762_v10 }
 0x285   : > { %v1126_v0 = vpop.eup %1125  ;;  %v769_v15 = vmul.f32 %v1124_v62, %v752_v58  ;;  %v796_v23 = vadd.f32 %v768_v1, %v764_v14  ;;  %v831_v58 = vunpack.c.0.s8 %v830_v49 }
 0x286   : > { %v1128_v7 = vpop.eup %1127  ;;  %v770_v12 = vmul.f32 %v1126_v0, %v756_v61  ;;  %v787_v27 = vadd.f32 %v767_v11, %v763_v18 }
 0x287   : > { %v1130_v13 = vpop.eup %1129  ;;  %v772_v16 = vmul.f32 %v1128_v7, %v756_v61  ;;  %v805_v31 = vadd.f32 %v769_v15, %v765_v22  ;;  %v834_v7 = vsub.s32 %v831_v58, %v1368_v9 }
 0x288   : > { %v1132_v17 = vpop.eup %1131  ;;  %v771_v20 = vmul.f32 %v1130_v13, %v756_v61  ;;  %v779_v29 = vadd.f32 %v778_v19, %v770_v12 }
 0x289   : > { %v1134_v21 = vpop.eup %1133  ;;  %v773_v24 = vmul.f32 %v1132_v17, %v756_v61  ;;  %v797_v32 = vadd.f32 %v796_v23, %v772_v16  ;;  %v817_v61 = vpop.permute.xlu0 %816 }
 0x28a   : > { %v1136_v26 = vpop.eup %1135  ;;  %v774_v28 = vmul.f32 %v1134_v21, %v760_v25  ;;  %v788_v34 = vadd.f32 %v787_v27, %v771_v20 }
 0x28b   : > { %v1138_v30 = vpop.eup %1137  ;;  %v776_v5 = vmul.f32 %v1136_v26, %v760_v25  ;;  %v806_v37 = vadd.f32 %v805_v31, %v773_v24 }
 0x28c   : > { %v1140_v6 = vpop.eup %1139  ;;  %v775_v4 = vmul.f32 %v1138_v30, %v760_v25  ;;  %v780_v33 = vadd.f32 %v779_v29, %v774_v28 }
 0x28d   : > { %v777_v35 = vmul.f32 %v1140_v6, %v760_v25  ;;  %v798_v36 = vadd.f32 %v797_v32, %v776_v5 }
 0x28e   : > { %v781_v3 = vrot.slane %v780_v33, 4  ;;  %v789_v38 = vadd.f32 %v788_v34, %v775_v4 }
 0x28f   : > { %v799_v39 = vrot.slane %v798_v36, 4  ;;  %v807_v40 = vadd.f32 %v806_v37, %v777_v35 }
 0x290   : > { %v782_v41 = vadd.f32 %v781_v3, %v780_v33  ;;  %v790_v2 = vrot.slane %v789_v38, 4 }
 0x291   : > { %v800_v42 = vadd.f32 %v799_v39, %v798_v36  ;;  %v808_v43 = vrot.slane %v807_v40, 4 }
 0x292   : > { %v791_v44 = vadd.f32 %v790_v2, %v789_v38  ;;  %v783_v45 = vrot.slane %v782_v41, 2 }
 0x293   : > { %v809_v46 = vadd.f32 %v808_v43, %v807_v40  ;;  %v801_v47 = vrot.slane %v800_v42, 2 }
 0x294   : > { %v784_v50 = vadd.f32 %v783_v45, %v782_v41  ;;  %v792_v51 = vrot.slane %v791_v44, 2 }
 0x295   : > { %v802_v52 = vadd.f32 %v801_v47, %v800_v42  ;;  %v810_v53 = vrot.slane %v809_v46, 2 }
 0x296   : > { %v785_v54 = vrot.slane %v784_v50, 1  ;;  %v793_v55 = vadd.f32 %v792_v51, %v791_v44 }
 0x297   : > { %v803_v56 = vrot.slane %v802_v52, 1  ;;  %v811_v57 = vadd.f32 %v810_v53, %v809_v46 }
 0x298   : > { %v786_v59 = vadd.f32 %v785_v54, %v784_v50  ;;  %v794_v60 = vrot.slane %v793_v55, 1 }
 0x299   : > { %v804_v62 = vadd.f32 %v803_v56, %v802_v52  ;;  %v812_v63 = vrot.slane %v811_v57, 1 }
 0x29a   : > { %v795_v0 = vadd.f32 %v794_v60, %v793_v55  ;;  %v819_v10 = vadd.f32 %v817_v61, %v786_v59 }
 0x29b   : > { %v813_v1 = vadd.f32 %v812_v63, %v811_v57  ;;  %v821_v12 = vadd.f32 %v817_v61, %v804_v62 }
 0x29c   : > { %v820_v11 = vadd.f32 %v817_v61, %v795_v0 }
 0x29d   : > { %v822_v13 = vadd.f32 %v817_v61, %v813_v1 }
 0x29e   : > { %v827_v14 = vcombine.low %v819_v10, %v820_v11 }
 0x29f   : > { %v828_v15 = vcombine.low %v821_v12, %v822_v13 }
 0x2a0   : > { %v835_v16 = vrot.slane %v827_v14, %v834_v7 }
 0x2a1   : > { %v842_v17 = vrot.slane %v828_v15, %v834_v7 }
 0x2a3   : > { %v843_v18 = vcombine.low %v835_v16, %v842_v17 }
 0x2a5   : > { %v850_v19 = vrot.slane %v843_v18, %v834_v7 }
 0x2a7   : > { %856 = vst.msk [vmem:[%s176_s5] sm:$0xf] %vm854_vm1, %v850_v19 }
 0x2a8   : > { %1180 = shalt.err (!%p1177_p0)
}
 0x2a9   : > { %s1181_s20 = scalar_lea.hbm %s870_s9, 64  ;;  %s1185_s26 = scalar_lea.hbm %s1457_s3, 128 }
 0x2aa   : > { %p1182_p1 = scmp.ne.s32.totalorder %s870_s9, %s1181_s20  ;;  %p1186_p4 = scmp.lt.s32.totalorder %s870_s9, %s1457_s3 }
 0x2ab   : > { %p1187_p7 = scmp.lt.s32.totalorder %s1185_s26, %s1181_s20 }
 0x2ac   : > { %p1183_p2 = pnand %p1182_p1, %p1303_p5 }
 0x2ad   : > { %p1188_p6 = por %p1187_p7, %p1186_p4 }
 0x2ae   : > { %p1184_p3 = pneg %p1183_p2 }
 0x2b0   : > { %p1189_p8 = pnand %p1188_p6, %p1184_p3 }
 0x2b2   : > { %1192 = shalt.err (!%p1189_p8)
}
 0x2b3   : > { %977 = dma.vmem_to_hbm [thread:$0]  (%p1303_p5), %s873_s6, 64, %s870_s9, %s858_s10  }
 0x2b4 PF: > { %p989_p9 = scmp.ge.s32.totalorder %s1231_s15, 2  ;;  %s884_s29 = sand.u32 1, %s1219_s12  }
 0x2b5   : > { %p1461_p10 = scmp.ne.s32.totalorder %s1459_s23, 0  ;;  %s885_s30 = scalar_lea.sflag [#allocation4], %s884_s29 }
 0x2b7   : > { %p984_p11 = pnand %p989_p9, %p1461_p10 }
 0x2b9   : > { %p985_p12 = pneg %p984_p11 }
 0x2bb   : > { %1214 = dma.done.wait (%p985_p12), %s885_s30, 64  }
 0x2bc   : > { %1216 = vsyncadd (%p985_p12), %s885_s30, 4294967232  ;;  %p14_p13 = scmp.ge.s32.totalorder %s1290_s18, 4   ;;  %s1462_s12 = smov %s1223_s13 }
 0x2bd   : > { %s1463_s13 = smov %s1227_s14  ;;  %s1464_s14 = smov %s1301_s21 }
 0x2be   : > { %s1465_s15 = smov %s1290_s18  ;;  %16 = sbr.rel (!%p14_p13) target bundleno = 4 (0x4), region = 73 }
 0x2c3   :  { %890 = vsyncpa [#allocation3], 1 }
 0x2c4   :  { %892 = vsyncpa [#allocation3 + $0x1], 1 }
 0x2c5   :  { %893 = vsyncpa [#allocation4], 1 }
 0x2c6   :  { %895 = vsyncpa [#allocation4 + $0x1], 1 }

</bundles_post_ra>
